<compile_context>
chip_gen: v5e
topology: v5e:2x2
jax: 0.10.0
libtpu: 0.0.40
codegen_flags: <defaults>
</compile_context>

<pallas_src>
import math
import jax
import jax.numpy as jnp
from jax.experimental import pallas as pl
from jax.experimental.pallas import tpu as pltpu

LANE = 128
SUBLANE = 8


def _round_up(x, m):
    return (x + m - 1) // m * m


def critic_kernel(sa_ref, w1_ref, b1_ref, w2_ref, b2_ref, w3_ref, b3_ref,
                  wv_ref, bv_ref, out_ref):
    x = sa_ref[...]                                             # (TB, F_pad) compute dtype

    # fc[0]: Linear(state_dim+1, h) + ReLU6       (MXU dot, f32 accumulate, f32 VPU)
    h = jnp.dot(x, w1_ref[...], preferred_element_type=jnp.float32) + b1_ref[...]
    h = jnp.clip(h, 0.0, 6.0)

    # fc[2]: Linear(h, h) + ReLU6
    h = jnp.dot(h.astype(w2_ref.dtype), w2_ref[...],
                preferred_element_type=jnp.float32) + b2_ref[...]
    h = jnp.clip(h, 0.0, 6.0)

    # fc[4]: Linear(h, h)   (no activation inside the Sequential)
    h = jnp.dot(h.astype(w3_ref.dtype), w3_ref[...],
                preferred_element_type=jnp.float32) + b3_ref[...]

    # F.relu on the fc output
    h = jnp.maximum(h, 0.0)

    # v_head: Linear(h, 1), padded to a lane-dense (TB, 128) slab (column 0 = value)
    v = jnp.dot(h.astype(wv_ref.dtype), wv_ref[...],
                preferred_element_type=jnp.float32) + bv_ref[...]
    out_ref[...] = v.astype(out_ref.dtype)


def critic_forward(sa, params, *, block_b=512, compute_dtype=jnp.bfloat16):
    """sa: [B, state_dim+1] f32.  params: f32 tuple from make_params.  Returns [B, 1] f32."""
    w1, b1, w2, b2, w3, b3, wv, bv = params
    B, F = sa.shape
    H = w1.shape[1]
    F_pad = _round_up(F, LANE)
    H_pad = _round_up(H, LANE)

    # Batch tile: multiple of the 8-row sublane, capped by block_b; pad B up to it.
    TB = _round_up(min(block_b, _round_up(B, SUBLANE)), SUBLANE)
    B_pad = _round_up(B, TB)
    grid = (B_pad // TB,)

    def pad_mat(a, rows, cols, dtype):
        out = jnp.zeros((rows, cols), dtype)
        return out.at[:a.shape[0], :a.shape[1]].set(a.astype(dtype))

    # Zero padding keeps the math exact (padded lanes stay 0 through every layer).
    sa_p = pad_mat(sa, B_pad, F_pad, compute_dtype)
    w1_p = pad_mat(w1, F_pad, H_pad, compute_dtype)
    w2_p = pad_mat(w2, H_pad, H_pad, compute_dtype)
    w3_p = pad_mat(w3, H_pad, H_pad, compute_dtype)
    wv_p = pad_mat(wv, H_pad, LANE, compute_dtype)      # only column 0 is real
    b1_p = pad_mat(b1.reshape(1, -1), 1, H_pad, jnp.float32)
    b2_p = pad_mat(b2.reshape(1, -1), 1, H_pad, jnp.float32)
    b3_p = pad_mat(b3.reshape(1, -1), 1, H_pad, jnp.float32)
    bv_p = pad_mat(bv.reshape(1, -1), 1, LANE, jnp.float32)

    def const(shape):  # weight/bias stays VMEM-resident across all batch tiles
        return pl.BlockSpec(shape, lambda i: (0, 0))

    nbytes = lambda a: int(a.size) * int(a.dtype.itemsize)
    cost = pl.CostEstimate(
        flops=2 * B_pad * (F_pad * H_pad + 2 * H_pad * H_pad + H_pad * LANE),
        transcendentals=0,
        bytes_accessed=sum(nbytes(a) for a in (sa_p, w1_p, b1_p, w2_p, b2_p,
                                               w3_p, b3_p, wv_p, bv_p))
                       + B_pad * LANE * 4,
    )

    out = pl.pallas_call(
        critic_kernel,
        out_shape=jax.ShapeDtypeStruct((B_pad, LANE), jnp.float32),
        grid=grid,
        in_specs=[
            pl.BlockSpec((TB, F_pad), lambda i: (i, 0)),   # streamed sa tile
            const((F_pad, H_pad)), const((1, H_pad)),      # W1, b1
            const((H_pad, H_pad)), const((1, H_pad)),      # W2, b2
            const((H_pad, H_pad)), const((1, H_pad)),      # W3, b3
            const((H_pad, LANE)), const((1, LANE)),        # Wv, bv (lane-padded head)
        ],
        out_specs=pl.BlockSpec((TB, LANE), lambda i: (i, 0)),
        compiler_params=pltpu.CompilerParams(
            dimension_semantics=("parallel",),             # v7x: split tiles over 2 TCs
            vmem_limit_bytes=32 * 1024 * 1024,             # safe on v5e/v6e/v7x
        ),
        cost_estimate=cost,
    )(sa_p, w1_p, b1_p, w2_p, b2_p, w3_p, b3_p, wv_p, bv_p)

    return out[:B, :1]


def xavier_uniform(key, fan_in, fan_out):
    # Matches torch.nn.init.xavier_uniform_ (gain=1).  Stored pre-transposed [in, out].
    bound = math.sqrt(6.0 / (fan_in + fan_out))
    return jax.random.uniform(key, (fan_in, fan_out), jnp.float32, -bound, bound)


def make_params(key, state_dim, h_dim):
    in_dim = state_dim + 1
    k1, k2, k3, k4 = jax.random.split(key, 4)
    w1 = xavier_uniform(k1, in_dim, h_dim)
    w2 = xavier_uniform(k2, h_dim, h_dim)
    w3 = xavier_uniform(k3, h_dim, h_dim)
    wv = xavier_uniform(k4, h_dim, 1)
    # init_weights fills every Linear bias with 0.01
    b1 = jnp.full((1, h_dim), 0.01, jnp.float32)
    b2 = jnp.full((1, h_dim), 0.01, jnp.float32)
    b3 = jnp.full((1, h_dim), 0.01, jnp.float32)
    bv = jnp.full((1, 1), 0.01, jnp.float32)
    return (w1, b1, w2, b2, w3, b3, wv, bv)


def reference_forward(sa, params, compute_dtype=jnp.float32):
    # Mirrors the kernel's dtype handling: operands rounded to compute_dtype, f32 math.
    w1, b1, w2, b2, w3, b3, wv, bv = params
    cd = lambda a: a.astype(compute_dtype).astype(jnp.float32)
    h = jnp.clip(cd(sa) @ cd(w1) + b1, 0.0, 6.0)
    h = jnp.clip(cd(h) @ cd(w2) + b2, 0.0, 6.0)
    h = cd(h) @ cd(w3) + b3
    h = jnp.maximum(h, 0.0)
    return cd(h) @ cd(wv) + bv


if __name__ == "__main__":
    key = jax.random.PRNGKey(0)
    k_sa, k_p = jax.random.split(key)

    # Small shapes consistent with the module (h_dim default = 200).
    batch, state_dim, h_dim = 100, 16, 200
    sa = jax.random.normal(k_sa, (batch, state_dim + 1), jnp.float32)
    params = make_params(k_p, state_dim, h_dim)

    # block_b=32 forces a multi-step grid (4 tiles, last one partially padded).
    # f32 path: tight check.
    out_f32 = jax.block_until_ready(
        critic_forward(sa, params, block_b=32, compute_dtype=jnp.float32))
    ref_f32 = reference_forward(sa, params, compute_dtype=jnp.float32)
    assert out_f32.shape == (batch, 1)
    assert jnp.allclose(out_f32, ref_f32, atol=1e-4, rtol=1e-4), \
        float(jnp.max(jnp.abs(out_f32 - ref_f32)))

    # bf16 storage path (perf-preferred on v6e/v7x): f32 accumulate, looser tolerance.
    out_bf16 = jax.block_until_ready(
        critic_forward(sa, params, block_b=32, compute_dtype=jnp.bfloat16))
    ref_bf16 = reference_forward(sa, params, compute_dtype=jnp.bfloat16)
    assert out_bf16.shape == (batch, 1)
    assert jnp.allclose(out_bf16, ref_bf16, atol=2e-2, rtol=2e-2), \
        float(jnp.max(jnp.abs(out_bf16 - ref_bf16)))

    print("KERNEL_OK")
</pallas_src>

<mosaic_0001>
module attributes {stable_mosaic.version = 11 : i64} {
  func.func @critic_kernel(%arg0: i32, %arg1: memref<32x128xf32, #tpu.memory_space<vmem>>, %arg2: memref<128x256xf32, #tpu.memory_space<vmem>>, %arg3: memref<1x256xf32, #tpu.memory_space<vmem>>, %arg4: memref<256x256xf32, #tpu.memory_space<vmem>>, %arg5: memref<1x256xf32, #tpu.memory_space<vmem>>, %arg6: memref<256x256xf32, #tpu.memory_space<vmem>>, %arg7: memref<1x256xf32, #tpu.memory_space<vmem>>, %arg8: memref<256x128xf32, #tpu.memory_space<vmem>>, %arg9: memref<1x128xf32, #tpu.memory_space<vmem>>, %arg10: memref<32x128xf32, #tpu.memory_space<vmem>>) attributes {dimension_semantics = [#tpu.dimension_semantics<parallel>], iteration_bounds = array<i64: 4>, scalar_prefetch = 0 : i64, scratch_operands = 0 : i64, tpu.core_type = #tpu.core_type<tc>, window_params = [{transform_indices = @transform_0, window_bounds = array<i64: 32, 128>}, {pipeline_mode = #tpu.pipeline_mode<synchronous>, transform_indices = @transform_1, window_bounds = array<i64: 128, 256>}, {pipeline_mode = #tpu.pipeline_mode<synchronous>, transform_indices = @transform_2, window_bounds = array<i64: 1, 256>}, {pipeline_mode = #tpu.pipeline_mode<synchronous>, transform_indices = @transform_3, window_bounds = array<i64: 256, 256>}, {pipeline_mode = #tpu.pipeline_mode<synchronous>, transform_indices = @transform_4, window_bounds = array<i64: 1, 256>}, {pipeline_mode = #tpu.pipeline_mode<synchronous>, transform_indices = @transform_5, window_bounds = array<i64: 256, 256>}, {pipeline_mode = #tpu.pipeline_mode<synchronous>, transform_indices = @transform_6, window_bounds = array<i64: 1, 256>}, {pipeline_mode = #tpu.pipeline_mode<synchronous>, transform_indices = @transform_7, window_bounds = array<i64: 256, 128>}, {pipeline_mode = #tpu.pipeline_mode<synchronous>, transform_indices = @transform_8, window_bounds = array<i64: 1, 128>}, {transform_indices = @transform_9, window_bounds = array<i64: 32, 128>}]} {
    %c0 = arith.constant 0 : index
    %c0_0 = arith.constant 0 : index
    %0 = vector.load %arg1[%c0, %c0_0] : memref<32x128xf32, #tpu.memory_space<vmem>>, vector<32x128xf32>
    %c0_1 = arith.constant 0 : index
    %c0_2 = arith.constant 0 : index
    %1 = vector.load %arg2[%c0_1, %c0_2] : memref<128x256xf32, #tpu.memory_space<vmem>>, vector<128x256xf32>
    %cst = arith.constant dense<0.000000e+00> : vector<32x256xf32>
    %2 = tpu.matmul %0, %1, %cst {dimension_numbers = #tpu.dot_dimension_numbers<[1], [0], [0], [1], [0, 0, 1, 1], [], []>} : vector<32x128xf32>, vector<128x256xf32>, vector<32x256xf32> -> vector<32x256xf32>
    %c0_3 = arith.constant 0 : index
    %c0_4 = arith.constant 0 : index
    %3 = vector.load %arg3[%c0_3, %c0_4] : memref<1x256xf32, #tpu.memory_space<vmem>>, vector<1x256xf32>
    %4 = vector.broadcast %3 : vector<1x256xf32> to vector<32x256xf32>
    %5 = arith.addf %2, %4 : vector<32x256xf32>
    %cst_5 = arith.constant 0.000000e+00 : f32
    %cst_6 = arith.constant 6.000000e+00 : f32
    %6 = vector.broadcast %cst_5 : f32 to vector<32x256xf32>
    %7 = arith.maximumf %6, %5 : vector<32x256xf32>
    %8 = vector.broadcast %cst_6 : f32 to vector<32x256xf32>
    %9 = arith.minimumf %8, %7 : vector<32x256xf32>
    %c0_7 = arith.constant 0 : index
    %c0_8 = arith.constant 0 : index
    %10 = vector.load %arg4[%c0_7, %c0_8] : memref<256x256xf32, #tpu.memory_space<vmem>>, vector<256x256xf32>
    %cst_9 = arith.constant dense<0.000000e+00> : vector<32x256xf32>
    %11 = tpu.matmul %9, %10, %cst_9 {dimension_numbers = #tpu.dot_dimension_numbers<[1], [0], [0], [1], [0, 0, 1, 1], [], []>} : vector<32x256xf32>, vector<256x256xf32>, vector<32x256xf32> -> vector<32x256xf32>
    %c0_10 = arith.constant 0 : index
    %c0_11 = arith.constant 0 : index
    %12 = vector.load %arg5[%c0_10, %c0_11] : memref<1x256xf32, #tpu.memory_space<vmem>>, vector<1x256xf32>
    %13 = vector.broadcast %12 : vector<1x256xf32> to vector<32x256xf32>
    %14 = arith.addf %11, %13 : vector<32x256xf32>
    %cst_12 = arith.constant 0.000000e+00 : f32
    %cst_13 = arith.constant 6.000000e+00 : f32
    %15 = vector.broadcast %cst_12 : f32 to vector<32x256xf32>
    %16 = arith.maximumf %15, %14 : vector<32x256xf32>
    %17 = vector.broadcast %cst_13 : f32 to vector<32x256xf32>
    %18 = arith.minimumf %17, %16 : vector<32x256xf32>
    %c0_14 = arith.constant 0 : index
    %c0_15 = arith.constant 0 : index
    %19 = vector.load %arg6[%c0_14, %c0_15] : memref<256x256xf32, #tpu.memory_space<vmem>>, vector<256x256xf32>
    %cst_16 = arith.constant dense<0.000000e+00> : vector<32x256xf32>
    %20 = tpu.matmul %18, %19, %cst_16 {dimension_numbers = #tpu.dot_dimension_numbers<[1], [0], [0], [1], [0, 0, 1, 1], [], []>} : vector<32x256xf32>, vector<256x256xf32>, vector<32x256xf32> -> vector<32x256xf32>
    %c0_17 = arith.constant 0 : index
    %c0_18 = arith.constant 0 : index
    %21 = vector.load %arg7[%c0_17, %c0_18] : memref<1x256xf32, #tpu.memory_space<vmem>>, vector<1x256xf32>
    %22 = vector.broadcast %21 : vector<1x256xf32> to vector<32x256xf32>
    %23 = arith.addf %20, %22 : vector<32x256xf32>
    %cst_19 = arith.constant 0.000000e+00 : f32
    %24 = vector.broadcast %cst_19 : f32 to vector<32x256xf32>
    %25 = arith.maximumf %23, %24 : vector<32x256xf32>
    %c0_20 = arith.constant 0 : index
    %c0_21 = arith.constant 0 : index
    %26 = vector.load %arg8[%c0_20, %c0_21] : memref<256x128xf32, #tpu.memory_space<vmem>>, vector<256x128xf32>
    %cst_22 = arith.constant dense<0.000000e+00> : vector<32x128xf32>
    %27 = tpu.matmul %25, %26, %cst_22 {dimension_numbers = #tpu.dot_dimension_numbers<[1], [0], [0], [1], [0, 0, 1, 1], [], []>} : vector<32x256xf32>, vector<256x128xf32>, vector<32x128xf32> -> vector<32x128xf32>
    %c0_23 = arith.constant 0 : index
    %c0_24 = arith.constant 0 : index
    %28 = vector.load %arg9[%c0_23, %c0_24] : memref<1x128xf32, #tpu.memory_space<vmem>>, vector<1x128xf32>
    %29 = vector.broadcast %28 : vector<1x128xf32> to vector<32x128xf32>
    %30 = arith.addf %27, %29 : vector<32x128xf32>
    %c0_25 = arith.constant 0 : index
    %c0_26 = arith.constant 0 : index
    %31 = vector.load %arg10[%c0_25, %c0_26] : memref<32x128xf32, #tpu.memory_space<vmem>>, vector<32x128xf32>
    tpu.vector_store %arg10[%c0_25, %c0_26], %30 {strides = array<i32>} : memref<32x128xf32, #tpu.memory_space<vmem>>, vector<32x128xf32>,
    return
  }
  func.func @transform_0(%arg0: i32) -> (i32, i32) {
    %c0_i32 = arith.constant 0 : i32
    %c0_i32_0 = arith.constant 0 : i32
    return %arg0, %c0_i32 : i32, i32
  }
  func.func @transform_1(%arg0: i32) -> (i32, i32) {
    %c0_i32 = arith.constant 0 : i32
    %c0_i32_0 = arith.constant 0 : i32
    %c0_i32_1 = arith.constant 0 : i32
    return %c0_i32, %c0_i32_0 : i32, i32
  }
  func.func @transform_2(%arg0: i32) -> (i32, i32) {
    %c0_i32 = arith.constant 0 : i32
    %c0_i32_0 = arith.constant 0 : i32
    %c0_i32_1 = arith.constant 0 : i32
    return %c0_i32, %c0_i32_0 : i32, i32
  }
  func.func @transform_3(%arg0: i32) -> (i32, i32) {
    %c0_i32 = arith.constant 0 : i32
    %c0_i32_0 = arith.constant 0 : i32
    %c0_i32_1 = arith.constant 0 : i32
    return %c0_i32, %c0_i32_0 : i32, i32
  }
  func.func @transform_4(%arg0: i32) -> (i32, i32) {
    %c0_i32 = arith.constant 0 : i32
    %c0_i32_0 = arith.constant 0 : i32
    %c0_i32_1 = arith.constant 0 : i32
    return %c0_i32, %c0_i32_0 : i32, i32
  }
  func.func @transform_5(%arg0: i32) -> (i32, i32) {
    %c0_i32 = arith.constant 0 : i32
    %c0_i32_0 = arith.constant 0 : i32
    %c0_i32_1 = arith.constant 0 : i32
    return %c0_i32, %c0_i32_0 : i32, i32
  }
  func.func @transform_6(%arg0: i32) -> (i32, i32) {
    %c0_i32 = arith.constant 0 : i32
    %c0_i32_0 = arith.constant 0 : i32
    %c0_i32_1 = arith.constant 0 : i32
    return %c0_i32, %c0_i32_0 : i32, i32
  }
  func.func @transform_7(%arg0: i32) -> (i32, i32) {
    %c0_i32 = arith.constant 0 : i32
    %c0_i32_0 = arith.constant 0 : i32
    %c0_i32_1 = arith.constant 0 : i32
    return %c0_i32, %c0_i32_0 : i32, i32
  }
  func.func @transform_8(%arg0: i32) -> (i32, i32) {
    %c0_i32 = arith.constant 0 : i32
    %c0_i32_0 = arith.constant 0 : i32
    %c0_i32_1 = arith.constant 0 : i32
    return %c0_i32, %c0_i32_0 : i32, i32
  }
  func.func @transform_9(%arg0: i32) -> (i32, i32) {
    %c0_i32 = arith.constant 0 : i32
    %c0_i32_0 = arith.constant 0 : i32
    return %arg0, %c0_i32 : i32, i32
  }
}

</mosaic_0001>

<bundles_post_ra>
// kernel: tpu_custom_call.1
= control target key start
LH: loop header
LB: loop body
LE: loop exit
PB: predicated region body
PF: predicated region fallthrough
CT: control target
= control target key end

     0   :  { %s1851_s0 = inlined_call_operand.hbm [shape: f32[128,128], index: 0, kind: input, shape index: {}]   ;;  %s1852_s1 = inlined_call_operand.hbm [shape: f32[128,256], index: 1, kind: input, shape index: {}]   ;;  %s1853_s2 = inlined_call_operand.hbm [shape: f32[1,256], index: 2, kind: input, shape index: {}]   ;;  %s1854_s3 = inlined_call_operand.hbm [shape: f32[256,256], index: 3, kind: input, shape index: {}]   ;;  %s1855_s4 = inlined_call_operand.vmem [shape: f32[1,256], index: 4, kind: input, shape index: {}]   ;;  %s1856_s5 = inlined_call_operand.hbm [shape: f32[256,256], index: 5, kind: input, shape index: {}]   ;;  %s1857_s6 = inlined_call_operand.vmem [shape: f32[1,256], index: 6, kind: input, shape index: {}]   ;;  %s1858_s7 = inlined_call_operand.hbm [shape: f32[256,128], index: 7, kind: input, shape index: {}]   ;;  %s1859_s8 = inlined_call_operand.vmem [shape: f32[1,128], index: 8, kind: input, shape index: {}]   ;;  %s1860_s9 = inlined_call_operand.hbm [shape: f32[128,128], index: 9, kind: output, shape index: {}]  }
   0x1   :  { %1863 = sst [smem:[#allocation19_spill]] %s1852_s1 }
   0x2   :  { %1864 = sst [smem:[#allocation20_spill]] %s1853_s2 }
   0x3   :  { %1865 = sst [smem:[#allocation21_spill]] %s1854_s3 }
   0x4   :  { %14 = vsyncpa [#allocation3], 0 }
   0x5   :  { %16 = vsyncpa [#allocation3 + $0x1], 0 }
   0x6   :  { %17 = vsyncpa [#allocation6], 0 }
   0x7   :  { %18 = vsyncpa [#allocation9], 0 }
   0x8   :  { %19 = vsyncpa [#allocation12], 0 }
   0x9   :  { %20 = vsyncpa [#allocation4], 0 }
   0xa   :  { %22 = vsyncpa [#allocation4 + $0x1], 0  ;;  %s1634_s30 = smov 0   ;;  %s1636_s10 = smov 0  }
   0xb   :  { %s1638_s11 = smov 0   ;;  %s1640_s12 = smov 0  }
   0xc LB: > { %s1866_s1 = sld [smem:[#allocation19_spill]]  ;;  %s1658_s16 = sadd.s32 4294967295, %s1571_s12   ;;  %s1571_s12 = sphi %s1640_s12, %s1880_s12   ;;  %s1567_s11 = sphi %s1638_s11, %s1879_s11   ;;  %s1563_s10 = sphi %s1636_s10, %s1878_s10   ;;  %s1559_s30 = sphi %s1634_s30, %s1877_s30  }
   0xd   : > { %p1184_p0 = scmp.ge.s32.totalorder %s1571_s12, 1  ;;  %p49_p1 = scmp.eq.s32.totalorder %s1658_s16, 0 }
   0xe   : > { %p253_p2 = scmp.lt.s32.totalorder %s1571_s12, 5  ;;  %s1573_s18 = smov [#allocation5]  }
   0xf   : > { %s266_s19 = sshll.u32 %s1573_s18, 4  ;;  %s1868_s3 = sld [smem:[#allocation21_spill]]  ;;  %s267_s19 = int_to_ptr.vmem [resolvable:$true] %s266_s19 }
  0x10   : > { %p1663_p3 = pnand %p1184_p0, %p253_p2  ;;  %s1870_s2 = sld [smem:[#allocation20_spill]] }
  0x11   : > { %s1574_s27 = smov [#allocation8]   ;;  %s1575_s29 = smov 256  }
  0x12   : > { %s264_s15 = sshll.u32 %s1866_s1, 4  ;;  %p1233_p4 = pneg %p1663_p3  ;;  %s265_s15 = int_to_ptr.hbm [resolvable:$true] %s264_s15 }
  0x13   : > { %s292_s28 = sshll.u32 %s1574_s27, 4  ;;  %s1576_s13 = smov 16   ;;  %s293_s28 = int_to_ptr.vmem [resolvable:$true] %s292_s28 }
  0x14   : > { %p1674_p5 = pnand %p1233_p4, %p49_p1  ;;  %s307_s20 = sshll.u32 %s1856_s5, 4  ;;  %s308_s20 = int_to_ptr.hbm [resolvable:$true] %s307_s20 }
  0x15   : > { %s290_s22 = sshll.u32 %s1868_s3, 4  ;;  %s1577_s21 = smov [#allocation7]   ;;  %s291_s22 = int_to_ptr.hbm [resolvable:$true] %s290_s22 }
  0x16   : > { %s279_s26 = sshll.u32 %s1870_s2, 4  ;;  %s281_s1 = sshll.u32 %s1577_s21, 4  ;;  %s280_s26 = int_to_ptr.hbm [resolvable:$true] %s279_s26  ;;  %s282_s1 = int_to_ptr.vmem [resolvable:$true] %s281_s1 }
  0x17   : > { %1236 = dma.hbm_to_vmem [thread:$0]  (!%p1674_p5), %s265_s15, 4096, %s267_s19, [#allocation6], %s1575_s29, %s1575_s29, %s1576_s13  }
  0x18   : > { %1242 = dma.hbm_to_vmem [thread:$0]  (!%p1674_p5), %s291_s22, 8192, %s293_s28, [#allocation9], %s1575_s29, %s1575_s29, %s1576_s13  }
  0x19   : > { %1239 = dma.hbm_to_vmem [thread:$0]  (!%p1674_p5), %s280_s26, 32, %s282_s1, [#allocation6]  }
  0x1a   : > { %s1578_s15 = smov [#allocation10]   ;;  %s324_s25 = sshll.u32 %s1858_s7, 4  ;;  %s325_s25 = int_to_ptr.hbm [resolvable:$true] %s324_s25 }
  0x1b   : > { %s309_s19 = sshll.u32 %s1578_s15, 4  ;;  %s1579_s27 = smov [#allocation11]   ;;  %s310_s19 = int_to_ptr.vmem [resolvable:$true] %s309_s19 }
  0x1c   : > { %1245 = dma.hbm_to_vmem [thread:$0]  (!%p1674_p5), %s308_s20, 8192, %s310_s19, [#allocation9], %s1575_s29, %s1575_s29, %s1576_s13  }
  0x1d   : > { %s326_s1 = sshll.u32 %s1579_s27, 4  ;;  %s1861_s26 = smov 128   ;;  %s327_s1 = int_to_ptr.vmem [resolvable:$true] %s326_s1 }
  0x1e   : > { %s1862_s28 = smov 8   ;;  %s1183_s14 = sadd.s32 4294967294, %s1571_s12  }
  0x1f   : > { %1248 = dma.hbm_to_vmem [thread:$0]  (!%p1674_p5), %s325_s25, 4096, %s327_s1, [#allocation12], %s1861_s26, %s1861_s26, %s1862_s28  }
  0x20   : > { %s1702_s18 = sadd.s32 1, %s1571_s12   ;;  %s35_s21 = sadd.s32 1, %s1567_s11 }
  0x21   : > { %s32_s29 = ssub.s32 %s1571_s12, %s1702_s18  ;;  %p42_p6 = scmp.ne.s32.totalorder %s1567_s11, %s1563_s10 }
  0x22   : > { %p33_p7 = scmp.eq.s32.totalorder %s32_s29, 0  ;;  %p43_p8 = scmp.eq.s32.totalorder %s1571_s12, 0 }
  0x23   : > { %p48_p9 = scmp.ne.s32.totalorder %s1563_s10, %s1559_s30  ;;  %p240_p10 = scmp.eq.s32.totalorder %s1658_s16, 3 }
  0x24   : > { %s1714_s13 = scalar_select %p33_p7, %s1567_s11, %s35_s21  }
  0x25   : > { %p1718_p11 = por %p49_p1, %p48_p9  ;;  %p1722_p12 = por %p240_p10, %p42_p6 }
  0x26   : > { %p246_p13 = scmp.eq.s32.totalorder %s1183_s14, 3  ;;  %p44_p0 = por %p43_p8, %p42_p6 }
  0x27   : > { %s343_s15 = sand.u32 1, %s1567_s11   ;;  %p1262_p4 = scmp.lt.s32.totalorder %s1571_s12, 4 }
  0x28   : > { %p1727_p2 = por %p246_p13, %p48_p9  ;;  %s1191_s22 = sshll.u32 %s343_s15, 5 }
  0x29   : > { %s1207_s24 = sshll.u32 %s1571_s12, 5  ;;  %s347_s29 = scalar_lea.vmem [#allocation2], %s1191_s22 }
  0x2a   : > { %s352_s1 = scalar_lea.hbm %s1851_s0, %s1207_s24  ;;  %s355_s26 = sshll.u32 %s347_s29, 4  ;;  %s356_s26 = int_to_ptr.vmem [resolvable:$true] %s355_s26 }
  0x2b   : > { %s353_s21 = sshll.u32 %s352_s1, 4  ;;  %p1736_p5 = pnand %p1262_p4, %p44_p0  ;;  %s354_s21 = int_to_ptr.hbm [resolvable:$true] %s353_s21 }
  0x2c   : > { %s344_s28 = scalar_lea.sflag [#allocation3], %s343_s15  ;;  %s1463_s2 = sshra.s32 %s354_s21, 4  ;;  %s1464_s2 = int_to_ptr.hbm [resolvable:$true] %s1463_s2 }
  0x2d   : > { %s1465_s3 = scalar_lea.hbm %s1464_s2, 32  ;;  %p1467_p7 = pneg %p1736_p5 }
  0x2e   : > { %p1466_p6 = scmp.ne.s32.totalorder %s1464_s2, %s1465_s3  ;;  %s1470_s22 = scalar_lea.hbm %s1851_s0, 128 }
  0x2f   : > { %p1471_p10 = scmp.lt.s32.totalorder %s1464_s2, %s1851_s0  ;;  %p1472_p13 = scmp.lt.s32.totalorder %s1470_s22, %s1465_s3 }
  0x30   : > { %p1468_p8 = pnand %p1467_p7, %p1466_p6 }
  0x31   : > { %p1473_p0 = por %p1472_p13, %p1471_p10 }
  0x32   : > { %p1469_p9 = pneg %p1468_p8 }
  0x34   : > { %p1474_p4 = pnand %p1473_p0, %p1469_p9 }
  0x36   : > { %1477 = shalt.err (!%p1474_p4)
}
  0x37   : > { %s1875_s15 = smov 8   ;;  %s1876_s29 = smov 128  }
  0x38   : > { %1252 = dma.hbm_to_vmem [thread:$0]  (!%p1736_p5), %s354_s21, 512, %s356_s26, %s344_s28, %s1876_s29, %s1876_s29, %s1875_s15  }
  0x39   : > { %367 = sbr.rel (%p1663_p3) target bundleno = 675 (0x2a3), region = 56  ;;  %s1756_s24 = sand.u32 (!%p1663_p3), 1, %s1563_s10  }
  0x3a   : > { %s1195_s2 = sshll.u32 (!%p1663_p3), %s1756_s24, 5  ;;  %s370_s3 = scalar_lea.sflag (!%p1663_p3), [#allocation3], %s1756_s24 }
  0x3b   : > { %s1762_s25 = scalar_lea.vmem (!%p1663_p3), [#allocation2], %s1195_s2 }
  0x3e   : > { %1538 = dma.done.wait (%p1718_p11), %s370_s3, 512  }
  0x3f   : > { %1540 = vsyncadd (%p1718_p11), %s370_s3, 4294966784 }
  0x40   : > { %1542 = dma.done.wait (%p49_p1), [#allocation6], 4128  }
  0x41   : > { %1544 = vsyncadd (%p49_p1), [#allocation6], 4294963168 }
  0x42   : > { %1546 = dma.done.wait (%p49_p1), [#allocation9], 16384  }
  0x43   : > { %1548 = vsyncadd (%p49_p1), [#allocation9], 4294950912 }
  0x44   : > { %1550 = dma.done.wait (%p49_p1), [#allocation12], 4096  }
  0x45   : > { %1552 = vsyncadd (%p49_p1), [#allocation12], 4294963200  ;;  %v470_v0 = vld [vmem:[#allocation5 + $0xf0] sm:$0xff]  ;;  %v468_v1 = vld [vmem:[#allocation5 + $0xe0] sm:$0xff]  ;;  %s433_s22 = scalar_lea.vmem [#allocation13], %s1195_s2  ;;  %s1208_s27 = sshll.u32 %s1658_s16, 5 }
  0x46   : > { %v471_v2 = vld [vmem:[#allocation5 + $0xf8] sm:$0xff]  ;;  %478 = vmatpush.msra.mxu0 %v470_v0  ;;  %v469_v3 = vld [vmem:[#allocation5 + $0xe8] sm:$0xff]  ;;  %v466_v4 = vld [vmem:[#allocation5 + $0xd0] sm:$0xff]  ;;  %s1058_s29 = scalar_lea.hbm %s1860_s9, %s1208_s27  ;;  %s1059_s3 = sshll.u32 %s433_s22, 4  ;;  %s1060_s3 = int_to_ptr.vmem [resolvable:$true] %s1059_s3 }
  0x47   : > { %507 = vmatpush.msra.mxu1 %v471_v2  ;;  %v467_v5 = vld [vmem:[#allocation5 + $0xd8] sm:$0xff]  ;;  %v464_v6 = vld [vmem:[#allocation5 + $0xc0] sm:$0xff]  ;;  %v465_v7 = vld [vmem:[#allocation5 + $0xc8] sm:$0xff]  ;;  %s1061_s2 = sshll.u32 %s1058_s29, 4  ;;  %s1513_s23 = scalar_lea.hbm %s1860_s9, 128  ;;  %s1062_s2 = int_to_ptr.hbm [resolvable:$true] %s1061_s2 }
  0x48   : > { %479 = vmatpush.msra.mxu0 %v468_v1  ;;  %v462_v8 = vld [vmem:[#allocation5 + $0xb0] sm:$0xff]  ;;  %v463_v9 = vld [vmem:[#allocation5 + $0xb8] sm:$0xff]  ;;  %v460_v10 = vld [vmem:[#allocation5 + $0xa0] sm:$0xff]  ;;  %s1507_s17 = sshra.s32 %s1062_s2, 4  ;;  %s1508_s17 = int_to_ptr.hbm [resolvable:$true] %s1507_s17 }
  0x49   : > { %508 = vmatpush.msra.mxu1 %v469_v3  ;;  %v461_v11 = vld [vmem:[#allocation5 + $0xa8] sm:$0xff]  ;;  %v458_v12 = vld [vmem:[#allocation5 + $0x90] sm:$0xff]  ;;  %v459_v13 = vld [vmem:[#allocation5 + $0x98] sm:$0xff]  ;;  %s1509_s16 = scalar_lea.hbm %s1508_s17, 32  ;;  %p1514_p5 = scmp.lt.s32.totalorder %s1508_s17, %s1860_s9 }
  0x4a   : > { %480 = vmatpush.msra.mxu0 %v466_v4  ;;  %v456_v14 = vld [vmem:[#allocation5 + $0x80] sm:$0xff]  ;;  %v457_v15 = vld [vmem:[#allocation5 + $0x88] sm:$0xff]  ;;  %v454_v16 = vld [vmem:[#allocation5 + $0x70] sm:$0xff]  ;;  %p1510_p1 = scmp.ne.s32.totalorder %s1508_s17, %s1509_s16  ;;  %p1515_p6 = scmp.lt.s32.totalorder %s1513_s23, %s1509_s16 }
  0x4b   : > { %509 = vmatpush.msra.mxu1 %v467_v5  ;;  %v455_v17 = vld [vmem:[#allocation5 + $0x78] sm:$0xff]  ;;  %v452_v18 = vld [vmem:[#allocation5 + $0x60] sm:$0xff]  ;;  %v453_v19 = vld [vmem:[#allocation5 + $0x68] sm:$0xff] }
  0x4c   : > { %481 = vmatpush.msra.mxu0 %v464_v6  ;;  %v450_v20 = vld [vmem:[#allocation5 + $0x50] sm:$0xff]  ;;  %v451_v21 = vld [vmem:[#allocation5 + $0x58] sm:$0xff]  ;;  %v448_v22 = vld [vmem:[#allocation5 + $0x40] sm:$0xff]  ;;  %p1511_p3 = pnand %p1510_p1, %p1722_p12  ;;  %p1516_p7 = por %p1515_p6, %p1514_p5 }
  0x4d   : > { %510 = vmatpush.msra.mxu1 %v465_v7  ;;  %v449_v23 = vld [vmem:[#allocation5 + $0x48] sm:$0xff]  ;;  %v446_v24 = vld [vmem:[#allocation5 + $0x30] sm:$0xff]  ;;  %v447_v25 = vld [vmem:[#allocation5 + $0x38] sm:$0xff] }
  0x4e   : > { %482 = vmatpush.msra.mxu0 %v462_v8  ;;  %v444_v26 = vld [vmem:[#allocation5 + $0x20] sm:$0xff]  ;;  %v445_v27 = vld [vmem:[#allocation5 + $0x28] sm:$0xff]  ;;  %v582_v28 = vld [vmem:[#allocation8 + $0xf0] sm:$0xff]  ;;  %p1512_p11 = pneg %p1511_p3 }
  0x4f   : > { %511 = vmatpush.msra.mxu1 %v463_v9  ;;  %v580_v29 = vld [vmem:[#allocation8 + $0xe0] sm:$0xff]  ;;  %v614_v30 = vld [vmem:[#allocation8 + $0x1f0] sm:$0xff]  ;;  %622 = vmatpush.msra.mxu2 %v582_v28  ;;  %v583_v39 = vld [vmem:[#allocation8 + $0xf8] sm:$0xff] }
  0x50   : > { %483 = vmatpush.msra.mxu0 %v460_v10  ;;  %v442_v31 = vld [vmem:[#allocation5 + $0x10] sm:$0xff]  ;;  %v443_v32 = vld [vmem:[#allocation5 + $0x18] sm:$0xff]  ;;  %651 = vmatpush.msra.mxu3 %v614_v30  ;;  %v612_v33 = vld [vmem:[#allocation8 + $0x1e0] sm:$0xff]  ;;  %p1517_p8 = pnand %p1516_p7, %p1512_p11 }
  0x51   : > { %512 = vmatpush.msra.mxu1 %v461_v11  ;;  %v578_v34 = vld [vmem:[#allocation8 + $0xd0] sm:$0xff]  ;;  %v440_v36 = vld [vmem:[#allocation5] sm:$0xff]  ;;  %v441_v37 = vld [vmem:[#allocation5 + $0x8] sm:$0xff]  ;;  %623 = vmatpush.msra.mxu2 %v580_v29 }
  0x52   : > { %484 = vmatpush.msra.mxu0 %v458_v12  ;;  %v610_v35 = vld [vmem:[#allocation8 + $0x1d0] sm:$0xff]  ;;  %652 = vmatpush.msra.mxu3 %v612_v33  ;;  %v436_v38 = vld [vmem:[%s1762_s25] sm:$0xff]  ;;  %v581_v43 = vld [vmem:[#allocation8 + $0xe8] sm:$0xff] }
  0x53   : > { %513 = vmatpush.msra.mxu1 %v459_v13  ;;  %v615_v40 = vld [vmem:[#allocation8 + $0x1f8] sm:$0xff]  ;;  %624 = vmatpush.msra.mxu2 %v578_v34  ;;  %v576_v41 = vld [vmem:[#allocation8 + $0xc0] sm:$0xff]  ;;  %v613_v44 = vld [vmem:[#allocation8 + $0x1e8] sm:$0xff] }
  0x54   : > { %485 = vmatpush.msra.mxu0 %v456_v14  ;;  %653 = vmatpush.msra.mxu3 %v610_v35  ;;  %v608_v42 = vld [vmem:[#allocation8 + $0x1c0] sm:$0xff]  ;;  %v574_v45 = vld [vmem:[#allocation8 + $0xb0] sm:$0xff]  ;;  %v579_v47 = vld [vmem:[#allocation8 + $0xd8] sm:$0xff] }
  0x55   : > { %514 = vmatpush.msra.mxu1 %v457_v15  ;;  %v606_v46 = vld [vmem:[#allocation8 + $0x1b0] sm:$0xff]  ;;  %625 = vmatpush.msra.mxu2 %v576_v41  ;;  %v611_v48 = vld [vmem:[#allocation8 + $0x1d8] sm:$0xff]  ;;  %v572_v49 = vld [vmem:[#allocation8 + $0xa0] sm:$0xff] }
  0x56   : > { %486 = vmatpush.msra.mxu0 %v454_v16  ;;  %654 = vmatpush.msra.mxu3 %v608_v42  ;;  %v604_v50 = vld [vmem:[#allocation8 + $0x1a0] sm:$0xff]  ;;  %v577_v51 = vld [vmem:[#allocation8 + $0xc8] sm:$0xff]  ;;  %v575_v54 = vld [vmem:[#allocation8 + $0xb8] sm:$0xff] }
  0x57   : > { %515 = vmatpush.msra.mxu1 %v455_v17  ;;  %626 = vmatpush.msra.mxu2 %v574_v45  ;;  %v609_v52 = vld [vmem:[#allocation8 + $0x1c8] sm:$0xff]  ;;  %v607_v55 = vld [vmem:[#allocation8 + $0x1b8] sm:$0xff]  ;;  %v570_v56 = vld [vmem:[#allocation8 + $0x90] sm:$0xff] }
  0x58   : > { %487 = vmatpush.msra.mxu0 %v452_v18  ;;  %655 = vmatpush.msra.mxu3 %v606_v46  ;;  %v437_v53 = vld [vmem:[%s1762_s25 + $0x8] sm:$0xff]  ;;  %v602_v57 = vld [vmem:[#allocation8 + $0x190] sm:$0xff]  ;;  %v571_v62 = vld [vmem:[#allocation8 + $0x98] sm:$0xff] }
  0x59   : > { %516 = vmatpush.msra.mxu1 %v453_v19  ;;  %627 = vmatpush.msra.mxu2 %v572_v49  ;;  %v573_v58 = vld [vmem:[#allocation8 + $0xa8] sm:$0xff]  ;;  %v568_v60 = vld [vmem:[#allocation8 + $0x80] sm:$0xff]  ;;  %v603_v63 = vld [vmem:[#allocation8 + $0x198] sm:$0xff] }
  0x5a   : > { %488 = vmatpush.msra.mxu0 %v450_v20  ;;  %656 = vmatpush.msra.mxu3 %v604_v50  ;;  %v605_v59 = vld [vmem:[#allocation8 + $0x1a8] sm:$0xff]  ;;  %v600_v61 = vld [vmem:[#allocation8 + $0x180] sm:$0xff]  ;;  %v566_v0 = vld [vmem:[#allocation8 + $0x70] sm:$0xff] }
  0x5b   : > { %517 = vmatpush.msra.mxu1 %v451_v21  ;;  %628 = vmatpush.msra.mxu2 %v570_v56  ;;  %v598_v1 = vld [vmem:[#allocation8 + $0x170] sm:$0xff]  ;;  %v569_v2 = vld [vmem:[#allocation8 + $0x88] sm:$0xff]  ;;  %v567_v5 = vld [vmem:[#allocation8 + $0x78] sm:$0xff] }
  0x5c   : > { %489 = vmatpush.msra.mxu0 %v448_v22  ;;  %657 = vmatpush.msra.mxu3 %v602_v57  ;;  %v601_v3 = vld [vmem:[#allocation8 + $0x188] sm:$0xff]  ;;  %v564_v6 = vld [vmem:[#allocation8 + $0x60] sm:$0xff]  ;;  %v599_v7 = vld [vmem:[#allocation8 + $0x178] sm:$0xff] }
  0x5d   : > { %518 = vmatpush.msra.mxu1 %v449_v23  ;;  %629 = vmatpush.msra.mxu2 %v568_v60  ;;  %v438_v4 = vld [vmem:[%s1762_s25 + $0x10] sm:$0xff]  ;;  %v596_v8 = vld [vmem:[#allocation8 + $0x160] sm:$0xff]  ;;  %v563_v13 = vld [vmem:[#allocation8 + $0x58] sm:$0xff] }
  0x5e   : > { %490 = vmatpush.msra.mxu0 %v446_v24  ;;  %658 = vmatpush.msra.mxu3 %v600_v61  ;;  %v565_v9 = vld [vmem:[#allocation8 + $0x68] sm:$0xff]  ;;  %v562_v10 = vld [vmem:[#allocation8 + $0x50] sm:$0xff]  ;;  %v560_v14 = vld [vmem:[#allocation8 + $0x40] sm:$0xff] }
  0x5f   : > { %519 = vmatpush.msra.mxu1 %v447_v25  ;;  %630 = vmatpush.msra.mxu2 %v566_v0  ;;  %v597_v11 = vld [vmem:[#allocation8 + $0x168] sm:$0xff]  ;;  %v594_v12 = vld [vmem:[#allocation8 + $0x150] sm:$0xff]  ;;  %v595_v15 = vld [vmem:[#allocation8 + $0x158] sm:$0xff] }
  0x60   : > { %491 = vmatpush.msra.mxu0 %v444_v26  ;;  %659 = vmatpush.msra.mxu3 %v598_v1  ;;  %v561_v16 = vld [vmem:[#allocation8 + $0x48] sm:$0xff]  ;;  %v439_v17 = vld [vmem:[%s1762_s25 + $0x18] sm:$0xff]  ;;  %v592_v19 = vld [vmem:[#allocation8 + $0x140] sm:$0xff]  ;;  %s1047_s25 = scalar_lea.sflag [#allocation4], %s1756_s24 }
  0x61   : > { %520 = vmatpush.msra.mxu1 %v445_v27  ;;  %631 = vmatpush.msra.mxu2 %v564_v6  ;;  %v558_v18 = vld [vmem:[#allocation8 + $0x30] sm:$0xff]  ;;  %v559_v20 = vld [vmem:[#allocation8 + $0x38] sm:$0xff]  ;;  %v593_v21 = vld [vmem:[#allocation8 + $0x148] sm:$0xff] }
  0x62   : > { %492 = vmatpush.msra.mxu0 %v442_v31  ;;  %660 = vmatpush.msra.mxu3 %v596_v8  ;;  %v556_v22 = vld [vmem:[#allocation8 + $0x20] sm:$0xff]  ;;  %v590_v23 = vld [vmem:[#allocation8 + $0x130] sm:$0xff]  ;;  %v557_v24 = vld [vmem:[#allocation8 + $0x28] sm:$0xff] }
  0x63   : > { %521 = vmatpush.msra.mxu1 %v443_v32  ;;  %632 = vmatpush.msra.mxu2 %v562_v10  ;;  %v591_v25 = vld [vmem:[#allocation8 + $0x138] sm:$0xff]  ;;  %v554_v26 = vld [vmem:[#allocation8 + $0x10] sm:$0xff]  ;;  %v588_v27 = vld [vmem:[#allocation8 + $0x120] sm:$0xff] }
  0x64   : > { %493 = vmatpush.msra.mxu0 %v440_v36  ;;  %661 = vmatpush.msra.mxu3 %v594_v12  ;;  %v555_v28 = vld [vmem:[#allocation8 + $0x18] sm:$0xff]  ;;  %v589_v29 = vld [vmem:[#allocation8 + $0x128] sm:$0xff]  ;;  %v552_v30 = vld [vmem:[#allocation8] sm:$0xff] }
  0x65   : > { %522 = vmatpush.msra.mxu1 %v441_v37  ;;  %494 = vmatmul.f32.vlgmr.msra.gmra.mxu0 %v436_v38  ;;  %v586_v31 = vld [vmem:[#allocation8 + $0x110] sm:$0xff]  ;;  %v553_v32 = vld [vmem:[#allocation8 + $0x8] sm:$0xff]  ;;  %v587_v33 = vld [vmem:[#allocation8 + $0x118] sm:$0xff] }
  0x66   : > { %523 = vmatmul.f32.vlgmr.msra.gmra.mxu1 %v436_v38  ;;  %680 = vmatpush.msrb.mxu0 %v583_v39  ;;  %v584_v34 = vld [vmem:[#allocation8 + $0x100] sm:$0xff]  ;;  %v585_v35 = vld [vmem:[#allocation8 + $0x108] sm:$0xff]  ;;  %v472_v36 = vld [vmem:[#allocation7] sm:$0x3] }
  0x67   : > { %709 = vmatpush.msrb.mxu1 %v615_v40  ;;  %633 = vmatpush.msra.mxu2 %v560_v14  ;;  %v1784_v37 = vperm.slane %v472_v36, 0  ;;  %v1786_v38 = vperm.slane %v472_v36, 1  ;;  %v816_v41 = vld [vmem:[#allocation10 + $0x1f0] sm:$0xff]  ;;  %v817_v42 = vld [vmem:[#allocation10 + $0x1f8] sm:$0xff]  ;;  %v815_v46 = vld [vmem:[#allocation10 + $0x1e8] sm:$0xff] }
  0x68   : > { %681 = vmatpush.msrb.mxu0 %v581_v43  ;;  %662 = vmatpush.msra.mxu3 %v592_v19  ;;  %v814_v43 = vld [vmem:[#allocation10 + $0x1e0] sm:$0xff]  ;;  %v784_v49 = vld [vmem:[#allocation10 + $0xf0] sm:$0xff]  ;;  %v785_v50 = vld [vmem:[#allocation10 + $0xf8] sm:$0xff] }
  0x69   : > { %710 = vmatpush.msrb.mxu1 %v613_v44  ;;  %634 = vmatpush.msra.mxu2 %v558_v18  ;;  %v810_v57 = vld [vmem:[#allocation10 + $0x1c0] sm:$0xff]  ;;  %v781_v60 = vld [vmem:[#allocation10 + $0xd8] sm:$0xff]  ;;  %v807_v6 = vld [vmem:[#allocation10 + $0x1a8] sm:$0xff] }
  0x6a   : > { %682 = vmatpush.msrb.mxu0 %v579_v47  ;;  %663 = vmatpush.msra.mxu3 %v590_v23  ;;  %v812_v47 = vld [vmem:[#allocation10 + $0x1d0] sm:$0xff]  ;;  %v809_v0 = vld [vmem:[#allocation10 + $0x1b8] sm:$0xff]  ;;  %v802_v19 = vld [vmem:[#allocation10 + $0x180] sm:$0xff] }
  0x6b   : > { %711 = vmatpush.msrb.mxu1 %v611_v48  ;;  %635 = vmatpush.msra.mxu2 %v556_v22  ;;  %v813_v48 = vld [vmem:[#allocation10 + $0x1d8] sm:$0xff]  ;;  %v772_v23 = vld [vmem:[#allocation10 + $0x90] sm:$0xff] }
  0x6c   : > { %683 = vmatpush.msrb.mxu0 %v577_v51  ;;  %664 = vmatpush.msra.mxu3 %v588_v27  ;;  %v777_v10 = vld [vmem:[#allocation10 + $0xb8] sm:$0xff] }
  0x6d   : > { %712 = vmatpush.msrb.mxu1 %v609_v52  ;;  %497 = vmatmul.f32.gmra.mxu0 %v437_v53  ;;  %v805_v14 = vld [vmem:[#allocation10 + $0x198] sm:$0xff] }
  0x6e   : > { %526 = vmatmul.f32.gmra.mxu1 %v437_v53  ;;  %684 = vmatpush.msrb.mxu0 %v575_v54  ;;  %v782_v53 = vld [vmem:[#allocation10 + $0xe0] sm:$0xff]  ;;  %v783_v54 = vld [vmem:[#allocation10 + $0xe8] sm:$0xff] }
  0x6f   : > { %713 = vmatpush.msrb.mxu1 %v607_v55  ;;  %636 = vmatpush.msra.mxu2 %v554_v26  ;;  %v801_v26 = vld [vmem:[#allocation10 + $0x178] sm:$0xff] }
  0x70   : > { %685 = vmatpush.msrb.mxu0 %v573_v58  ;;  %665 = vmatpush.msra.mxu3 %v586_v31  ;;  %v811_v58 = vld [vmem:[#allocation10 + $0x1c8] sm:$0xff] }
  0x71   : > { %714 = vmatpush.msrb.mxu1 %v605_v59  ;;  %637 = vmatpush.msra.mxu2 %v552_v30  ;;  %v780_v59 = vld [vmem:[#allocation10 + $0xd0] sm:$0xff]  ;;  %v771_v30 = vld [vmem:[#allocation10 + $0x88] sm:$0xff] }
  0x72   : > { %686 = vmatpush.msrb.mxu0 %v571_v62  ;;  %666 = vmatpush.msra.mxu3 %v584_v34  ;;  %v799_v34 = vld [vmem:[#allocation10 + $0x168] sm:$0xff] }
  0x73   : > { %715 = vmatpush.msrb.mxu1 %v603_v63  ;;  %824 = vmatpush.msrb.mxu2 %v784_v49  ;;  %v808_v63 = vld [vmem:[#allocation10 + $0x1b0] sm:$0xff]  ;;  %v769_v49 = vld [vmem:[#allocation10 + $0x78] sm:$0xff] }
  0x74   : > { %687 = vmatpush.msrb.mxu0 %v569_v2  ;;  %853 = vmatpush.msrb.mxu3 %v816_v41  ;;  %v797_v41 = vld [vmem:[#allocation10 + $0x158] sm:$0xff] }
  0x75   : > { %716 = vmatpush.msrb.mxu1 %v601_v3  ;;  %500 = vmatmul.f32.gmra.mxu0 %v438_v4  ;;  %v778_v3 = vld [vmem:[#allocation10 + $0xc0] sm:$0xff] }
  0x76   : > { %529 = vmatmul.f32.gmra.mxu1 %v438_v4  ;;  %688 = vmatpush.msrb.mxu0 %v567_v5  ;;  %v779_v4 = vld [vmem:[#allocation10 + $0xc8] sm:$0xff]  ;;  %v806_v5 = vld [vmem:[#allocation10 + $0x1a0] sm:$0xff] }
  0x77   : > { %717 = vmatpush.msrb.mxu1 %v599_v7  ;;  %854 = vmatpush.msrb.mxu3 %v814_v43 }
  0x78   : > { %689 = vmatpush.msrb.mxu0 %v565_v9  ;;  %825 = vmatpush.msrb.mxu2 %v782_v53  ;;  %v776_v9 = vld [vmem:[#allocation10 + $0xb0] sm:$0xff] }
  0x79   : > { %718 = vmatpush.msrb.mxu1 %v597_v11  ;;  %855 = vmatpush.msrb.mxu3 %v812_v47  ;;  %v764_v53 = vld [vmem:[#allocation10 + $0x50] sm:$0xff] }
  0x7a   : > { %690 = vmatpush.msrb.mxu0 %v563_v13  ;;  %826 = vmatpush.msrb.mxu2 %v780_v59  ;;  %v804_v13 = vld [vmem:[#allocation10 + $0x190] sm:$0xff]  ;;  %v763_v59 = vld [vmem:[#allocation10 + $0x48] sm:$0xff] }
  0x7b   : > { %719 = vmatpush.msrb.mxu1 %v595_v15  ;;  %856 = vmatpush.msrb.mxu3 %v810_v57  ;;  %v774_v15 = vld [vmem:[#allocation10 + $0xa0] sm:$0xff] }
  0x7c   : > { %691 = vmatpush.msrb.mxu0 %v561_v16  ;;  %827 = vmatpush.msrb.mxu2 %v778_v3  ;;  %v775_v16 = vld [vmem:[#allocation10 + $0xa8] sm:$0xff]  ;;  %v762_v57 = vld [vmem:[#allocation10 + $0x40] sm:$0xff]  ;;  %v756_v3 = vld [vmem:[#allocation10 + $0x10] sm:$0xff] }
  0x7d   : > { %503 = vmatmul.f32.gmra.mxu0 %v439_v17  ;;  %720 = vmatpush.msrb.mxu1 %v593_v21 }
  0x7e   : > { %532 = vmatmul.f32.gmra.mxu1 %v439_v17  ;;  %692 = vmatpush.msrb.mxu0 %v559_v20  ;;  %v803_v20 = vld [vmem:[#allocation10 + $0x188] sm:$0xff] }
  0x7f   : > { %721 = vmatpush.msrb.mxu1 %v591_v25  ;;  %857 = vmatpush.msrb.mxu3 %v808_v63  ;;  %v800_v25 = vld [vmem:[#allocation10 + $0x170] sm:$0xff]  ;;  %v761_v63 = vld [vmem:[#allocation10 + $0x38] sm:$0xff] }
  0x80   : > { %693 = vmatpush.msrb.mxu0 %v557_v24  ;;  %828 = vmatpush.msrb.mxu2 %v776_v9  ;;  %v773_v24 = vld [vmem:[#allocation10 + $0x98] sm:$0xff] }
  0x81   : > { %722 = vmatpush.msrb.mxu1 %v589_v29  ;;  %858 = vmatpush.msrb.mxu3 %v806_v5  ;;  %v770_v29 = vld [vmem:[#allocation10 + $0x80] sm:$0xff] }
  0x82   : > { %694 = vmatpush.msrb.mxu0 %v555_v28  ;;  %829 = vmatpush.msrb.mxu2 %v774_v15  ;;  %v754_v5 = vld [vmem:[#allocation10] sm:$0xff] }
  0x83   : > { %723 = vmatpush.msrb.mxu1 %v587_v33  ;;  %859 = vmatpush.msrb.mxu3 %v804_v13  ;;  %v798_v33 = vld [vmem:[#allocation10 + $0x160] sm:$0xff] }
  0x84   : > { %695 = vmatpush.msrb.mxu0 %v553_v32  ;;  %830 = vmatpush.msrb.mxu2 %v772_v23 }
  0x85   : > { %724 = vmatpush.msrb.mxu1 %v585_v35  ;;  %860 = vmatpush.msrb.mxu3 %v802_v19  ;;  %v768_v35 = vld [vmem:[#allocation10 + $0x70] sm:$0xff]  ;;  %v979_v19 = vld [vmem:[#allocation11 + $0xf8] sm:$0xff] }
  0x86   : > { %882 = vmatpush.msra.mxu0 %v785_v50  ;;  %831 = vmatpush.msrb.mxu2 %v770_v29  ;;  %v795_v50 = vld [vmem:[#allocation10 + $0x148] sm:$0xff] }
  0x87   : > { %911 = vmatpush.msra.mxu1 %v817_v42  ;;  %861 = vmatpush.msrb.mxu3 %v800_v25 }
  0x88   : > { %883 = vmatpush.msra.mxu0 %v783_v54  ;;  %832 = vmatpush.msrb.mxu2 %v768_v35  ;;  %v790_v54 = vld [vmem:[#allocation10 + $0x120] sm:$0xff] }
  0x89   : > { %912 = vmatpush.msra.mxu1 %v815_v46  ;;  %862 = vmatpush.msrb.mxu3 %v798_v33  ;;  %v960_v35 = vld [vmem:[#allocation11 + $0x60] sm:$0xff] }
  0x8a   : > { %884 = vmatpush.msra.mxu0 %v781_v60  ;;  %v789_v60 = vld [vmem:[#allocation10 + $0x118] sm:$0xff] }
  0x8b   : > { %913 = vmatpush.msra.mxu1 %v813_v48  ;;  %v794_v48 = vld [vmem:[#allocation10 + $0x140] sm:$0xff] }
  0x8c   : > { %885 = vmatpush.msra.mxu0 %v779_v4  ;;  %v757_v4 = vld [vmem:[#allocation10 + $0x18] sm:$0xff] }
  0x8d   : > { %914 = vmatpush.msra.mxu1 %v811_v58  ;;  %v788_v58 = vld [vmem:[#allocation10 + $0x110] sm:$0xff] }
  0x8e   : > { %886 = vmatpush.msra.mxu0 %v777_v10 }
  0x8f   : > { %915 = vmatpush.msra.mxu1 %v809_v0  ;;  %v787_v0 = vld [vmem:[#allocation10 + $0x108] sm:$0xff] }
  0x90   : > { %887 = vmatpush.msra.mxu0 %v775_v16 }
  0x91   : > { %916 = vmatpush.msra.mxu1 %v807_v6  ;;  %v755_v6 = vld [vmem:[#allocation10 + $0x8] sm:$0xff] }
  0x92   : > { %888 = vmatpush.msra.mxu0 %v773_v24 }
  0x93   : > { %917 = vmatpush.msra.mxu1 %v805_v14 }
  0x94   : > { %889 = vmatpush.msra.mxu0 %v771_v30  ;;  %v976_v30 = vld [vmem:[#allocation11 + $0xe0] sm:$0xff] }
  0x95   : > { %918 = vmatpush.msra.mxu1 %v803_v20  ;;  %v978_v20 = vld [vmem:[#allocation11 + $0xf0] sm:$0xff] }
  0x96   : > { %890 = vmatpush.msra.mxu0 %v769_v49  ;;  %v958_v49 = vld [vmem:[#allocation11 + $0x50] sm:$0xff] }
  0x97   : > { %919 = vmatpush.msra.mxu1 %v801_v26  ;;  %v977_v26 = vld [vmem:[#allocation11 + $0xe8] sm:$0xff] }
  0x99   : > { %920 = vmatpush.msra.mxu1 %v799_v34  ;;  %v975_v34 = vld [vmem:[#allocation11 + $0xd8] sm:$0xff] }
  0x9b   : > { %921 = vmatpush.msra.mxu1 %v797_v41 }
  0x9d   : > { %922 = vmatpush.msra.mxu1 %v795_v50 }
  0xe2   : > { %v495_v39 = vpop.f32.mrf.mxu0 }
  0xe3   : > { %v524_v40 = vpop.f32.mrf.mxu1  ;;  %v496_v44 = vadd.f32 %v495_v39, %v1784_v37 }
  0xe4   : > { %v525_v45 = vadd.f32 %v524_v40, %v1786_v38  ;;  %v796_v40 = vld [vmem:[#allocation10 + $0x150] sm:$0xff] }
  0xe5   : > { %v536_v51 = vmax.f32 %v496_v44, 0.0  ;;  %863 = vmatpush.msrb.mxu3 %v796_v40 }
  0xe6   : > { %v537_v52 = vmax.f32 %v525_v45, 0.0 }
  0xe7   : > { %v544_v55 = vmin.f32 %v536_v51, 6.0  ;;  %864 = vmatpush.msrb.mxu3 %v794_v48  ;;  %v767_v51 = vld [vmem:[#allocation10 + $0x68] sm:$0xff] }
  0xe8   : > { %v545_v56 = vmin.f32 %v537_v52, 6.0  ;;  %v793_v52 = vld [vmem:[#allocation10 + $0x138] sm:$0xff]  ;;  %891 = vmatpush.msra.mxu0 %v767_v51  ;;  %v973_v48 = vld [vmem:[#allocation11 + $0xc8] sm:$0xff] }
  0xe9   : > { %638 = vmatmul.f32.vlgmr.msra.gmra.mxu2 %v544_v55  ;;  %696 = vmatmul.f32.vlgmr.msrb.gmra.mxu0 %v544_v55  ;;  %v765_v55 = vld [vmem:[#allocation10 + $0x58] sm:$0xff]  ;;  %v957_v51 = vld [vmem:[#allocation11 + $0x48] sm:$0xff] }
  0xea   : > { %v498_v61 = vpop.f32.mrf.mxu0  ;;  %667 = vmatmul.f32.vlgmr.msra.gmra.mxu3 %v545_v56  ;;  %725 = vmatmul.f32.vlgmr.msrb.gmra.mxu1 %v545_v56  ;;  %v791_v56 = vld [vmem:[#allocation10 + $0x128] sm:$0xff] }
  0xeb   : > { %v527_v62 = vpop.f32.mrf.mxu1  ;;  %v499_v1 = vadd.f32 %v498_v61, %v1784_v37  ;;  %923 = vmatpush.msra.mxu1 %v793_v52  ;;  %892 = vmatpush.msra.mxu0 %v765_v55  ;;  %v760_v61 = vld [vmem:[#allocation10 + $0x30] sm:$0xff] }
  0xec   : > { %v528_v2 = vadd.f32 %v527_v62, %v1786_v38  ;;  %v786_v62 = vld [vmem:[#allocation10 + $0x100] sm:$0xff] }
  0xed   : > { %v538_v7 = vmax.f32 %v499_v1, 0.0  ;;  %924 = vmatpush.msra.mxu1 %v791_v56  ;;  %893 = vmatpush.msra.mxu0 %v763_v59  ;;  %v758_v1 = vld [vmem:[#allocation10 + $0x20] sm:$0xff] }
  0xee   : > { %v539_v8 = vmax.f32 %v528_v2, 0.0  ;;  %v759_v2 = vld [vmem:[#allocation10 + $0x28] sm:$0xff] }
  0xef   : > { %v546_v11 = vmin.f32 %v538_v7, 6.0  ;;  %925 = vmatpush.msra.mxu1 %v789_v60  ;;  %894 = vmatpush.msra.mxu0 %v761_v63  ;;  %v616_v7 = vld [vmem:[%s1855_s4] sm:$0x3] }
  0xf0   : > { %v547_v12 = vmin.f32 %v539_v8, 6.0  ;;  %v1799_v8 = vperm.slane %v616_v7, 1  ;;  %v1802_v13 = vperm.slane %v616_v7, 0 }
  0xf1   : > { %641 = vmatmul.f32.gmra.mxu2 %v546_v11  ;;  %699 = vmatmul.f32.gmra.mxu0 %v546_v11 }
  0xf2   : > { %v501_v17 = vpop.f32.mrf.mxu0  ;;  %670 = vmatmul.f32.gmra.mxu3 %v547_v12  ;;  %728 = vmatmul.f32.gmra.mxu1 %v547_v12 }
  0xf3   : > { %v530_v18 = vpop.f32.mrf.mxu1  ;;  %v502_v21 = vadd.f32 %v501_v17, %v1784_v37  ;;  %926 = vmatpush.msra.mxu1 %v787_v0  ;;  %895 = vmatpush.msra.mxu0 %v759_v2 }
  0xf4   : > { %v531_v22 = vadd.f32 %v530_v18, %v1786_v38 }
  0xf5   : > { %v540_v27 = vmax.f32 %v502_v21, 0.0  ;;  %896 = vmatpush.msra.mxu0 %v757_v4 }
  0xf6   : > { %v541_v28 = vmax.f32 %v531_v22, 0.0  ;;  %v963_v22 = vld [vmem:[#allocation11 + $0x78] sm:$0xff] }
  0xf7   : > { %v548_v31 = vmin.f32 %v540_v27, 6.0  ;;  %897 = vmatpush.msra.mxu0 %v755_v6  ;;  %v962_v27 = vld [vmem:[#allocation11 + $0x70] sm:$0xff] }
  0xf8   : > { %v549_v32 = vmin.f32 %v541_v28, 6.0 }
  0xf9   : > { %644 = vmatmul.f32.gmra.mxu2 %v548_v31  ;;  %702 = vmatmul.f32.gmra.mxu0 %v548_v31  ;;  %v961_v31 = vld [vmem:[#allocation11 + $0x68] sm:$0xff] }
  0xfa   : > { %v504_v36 = vpop.f32.mrf.mxu0  ;;  %673 = vmatmul.f32.gmra.mxu3 %v549_v32  ;;  %731 = vmatmul.f32.gmra.mxu1 %v549_v32 }
  0xfb   : > { %v533_v39 = vpop.f32.mrf.mxu1  ;;  %v505_v42 = vadd.f32 %v504_v36, %v1784_v37  ;;  %v766_v37 = vld [vmem:[#allocation10 + $0x60] sm:$0xff] }
  0xfc   : > { %v534_v43 = vadd.f32 %v533_v39, %v1786_v38  ;;  %v792_v38 = vld [vmem:[#allocation10 + $0x130] sm:$0xff]  ;;  %833 = vmatpush.msrb.mxu2 %v766_v37 }
  0xfd   : > { %v542_v44 = vmax.f32 %v505_v42, 0.0  ;;  %865 = vmatpush.msrb.mxu3 %v792_v38  ;;  %v974_v42 = vld [vmem:[#allocation11 + $0xd0] sm:$0xff]  ;;  %v972_v38 = vld [vmem:[#allocation11 + $0xc0] sm:$0xff] }
  0xfe   : > { %v543_v45 = vmax.f32 %v534_v43, 0.0  ;;  %834 = vmatpush.msrb.mxu2 %v764_v53  ;;  %v959_v43 = vld [vmem:[#allocation11 + $0x58] sm:$0xff] }
  0xff   : > { %v550_v46 = vmin.f32 %v542_v44, 6.0  ;;  %866 = vmatpush.msrb.mxu3 %v790_v54  ;;  %v971_v54 = vld [vmem:[#allocation11 + $0xb8] sm:$0xff] }
 0x100   : > { %v551_v47 = vmin.f32 %v543_v45, 6.0  ;;  %835 = vmatpush.msrb.mxu2 %v762_v57 }
 0x101   : > { %647 = vmatmul.f32.gmra.mxu2 %v550_v46  ;;  %705 = vmatmul.f32.gmra.mxu0 %v550_v46 }
 0x102   : > { %676 = vmatmul.f32.gmra.mxu3 %v551_v47  ;;  %734 = vmatmul.f32.gmra.mxu1 %v551_v47 }
 0x103   : > { %867 = vmatpush.msrb.mxu3 %v788_v58  ;;  %836 = vmatpush.msrb.mxu2 %v760_v61 }
 0x105   : > { %868 = vmatpush.msrb.mxu3 %v786_v62  ;;  %837 = vmatpush.msrb.mxu2 %v758_v1 }
 0x107   : > { %838 = vmatpush.msrb.mxu2 %v756_v3  ;;  %1013 = vmatpush.msra.mxu3 %v979_v19  ;;  %v952_v19 = vld [vmem:[#allocation11 + $0x20] sm:$0xff] }
 0x109   : > { %839 = vmatpush.msrb.mxu2 %v754_v5  ;;  %1014 = vmatpush.msra.mxu3 %v978_v20  ;;  %v965_v20 = vld [vmem:[#allocation11 + $0x88] sm:$0xff] }
 0x10b   : > { %984 = vmatpush.msra.mxu2 %v963_v22  ;;  %1015 = vmatpush.msra.mxu3 %v977_v26  ;;  %v964_v22 = vld [vmem:[#allocation11 + $0x80] sm:$0xff]  ;;  %v818_v26 = vld [vmem:[%s1857_s6] sm:$0x3] }
 0x10d   : > { %985 = vmatpush.msra.mxu2 %v962_v27  ;;  %1016 = vmatpush.msra.mxu3 %v976_v30 }
 0x10f   : > { %986 = vmatpush.msra.mxu2 %v961_v31  ;;  %1017 = vmatpush.msra.mxu3 %v975_v34 }
 0x111   : > { %987 = vmatpush.msra.mxu2 %v960_v35  ;;  %1018 = vmatpush.msra.mxu3 %v974_v42 }
 0x113   : > { %988 = vmatpush.msra.mxu2 %v959_v43  ;;  %1019 = vmatpush.msra.mxu3 %v973_v48 }
 0x115   : > { %989 = vmatpush.msra.mxu2 %v958_v49  ;;  %1020 = vmatpush.msra.mxu3 %v972_v38 }
 0x117   : > { %990 = vmatpush.msra.mxu2 %v957_v51  ;;  %1021 = vmatpush.msra.mxu3 %v971_v54 }
 0x166   : > { %v697_v9 = vpop.f32.mrf.mxu0 }
 0x167   : > { %v698_v10 = vadd.f32 %v697_v9, %v1799_v8  ;;  %v726_v11 = vpop.f32.mrf.mxu1 }
 0x169   : > { %v727_v12 = vadd.f32 %v726_v11, %v698_v10  ;;  %v956_v11 = vld [vmem:[#allocation11 + $0x40] sm:$0xff] }
 0x16a   : > { %991 = vmatpush.msra.mxu2 %v956_v11 }
 0x16b   : > { %v739_v14 = vmax.f32 %v727_v12, 0.0  ;;  %v969_v12 = vld [vmem:[#allocation11 + $0xa8] sm:$0xff] }
 0x16c   : > { %v639_v15 = vpop.f32.mrf.mxu2 }
 0x16d   : > { %v747_v16 = vmin.f32 %v739_v14, 6.0  ;;  %v640_v17 = vadd.f32 %v639_v15, %v1802_v13  ;;  %v668_v18 = vpop.f32.mrf.mxu3  ;;  %v955_v14 = vld [vmem:[#allocation11 + $0x38] sm:$0xff]  ;;  %v968_v15 = vld [vmem:[#allocation11 + $0xa0] sm:$0xff] }
 0x16e   : > { %v700_v21 = vpop.f32.mrf.mxu0  ;;  %992 = vmatpush.msra.mxu2 %v955_v14 }
 0x16f   : > { %v669_v23 = vadd.f32 %v668_v18, %v640_v17  ;;  %v701_v24 = vadd.f32 %v700_v21, %v1799_v8  ;;  %869 = vmatmul.f32.vlgmr.msrb.gmra.mxu3 %v747_v16  ;;  %927 = vmatmul.f32.vlgmr.msra.gmra.mxu1 %v747_v16  ;;  %v729_v25 = vpop.f32.mrf.mxu1  ;;  %v967_v16 = vld [vmem:[#allocation11 + $0x98] sm:$0xff]  ;;  %v953_v17 = vld [vmem:[#allocation11 + $0x28] sm:$0xff]  ;;  %v966_v18 = vld [vmem:[#allocation11 + $0x90] sm:$0xff] }
 0x170   : > { %v951_v21 = vld [vmem:[#allocation11 + $0x18] sm:$0xff] }
 0x171   : > { %v738_v28 = vmax.f32 %v669_v23, 0.0  ;;  %v730_v29 = vadd.f32 %v729_v25, %v701_v24  ;;  %v950_v23 = vld [vmem:[#allocation11 + $0x10] sm:$0xff]  ;;  %v949_v24 = vld [vmem:[#allocation11 + $0x8] sm:$0xff]  ;;  %v948_v25 = vld [vmem:[#allocation11] sm:$0xff] }
 0x173   : > { %v746_v32 = vmin.f32 %v738_v28, 6.0  ;;  %v741_v33 = vmax.f32 %v730_v29, 0.0  ;;  %v821_v28 = vperm.slane %v818_v26, 1 }
 0x174   : > { %v642_v36 = vpop.f32.mrf.mxu2 }
 0x175   : > { %v643_v39 = vadd.f32 %v642_v36, %v1802_v13  ;;  %840 = vmatmul.f32.vlgmr.msrb.gmra.mxu2 %v746_v32  ;;  %898 = vmatmul.f32.vlgmr.msra.gmra.mxu0 %v746_v32  ;;  %v671_v40 = vpop.f32.mrf.mxu3  ;;  %v749_v41 = vmin.f32 %v741_v33, 6.0  ;;  %v820_v33 = vperm.slane %v818_v26, 0 }
 0x176   : > { %v703_v44 = vpop.f32.mrf.mxu0 }
 0x177   : > { %v672_v45 = vadd.f32 %v671_v40, %v643_v39  ;;  %v704_v46 = vadd.f32 %v703_v44, %v1799_v8  ;;  %872 = vmatmul.f32.gmra.mxu3 %v749_v41  ;;  %930 = vmatmul.f32.gmra.mxu1 %v749_v41  ;;  %v732_v47 = vpop.f32.mrf.mxu1 }
 0x179   : > { %v740_v50 = vmax.f32 %v672_v45, 0.0  ;;  %v733_v37 = vadd.f32 %v732_v47, %v704_v46 }
 0x17b   : > { %v743_v52 = vmax.f32 %v733_v37, 0.0  ;;  %v748_v53 = vmin.f32 %v740_v50, 6.0 }
 0x17c   : > { %v645_v55 = vpop.f32.mrf.mxu2 }
 0x17d   : > { %v646_v56 = vadd.f32 %v645_v55, %v1802_v13  ;;  %843 = vmatmul.f32.gmra.mxu2 %v748_v53  ;;  %901 = vmatmul.f32.gmra.mxu0 %v748_v53  ;;  %v674_v57 = vpop.f32.mrf.mxu3  ;;  %v751_v58 = vmin.f32 %v743_v52, 6.0 }
 0x17e   : > { %v706_v59 = vpop.f32.mrf.mxu0 }
 0x17f   : > { %v675_v60 = vadd.f32 %v674_v57, %v646_v56  ;;  %v707_v61 = vadd.f32 %v706_v59, %v1799_v8  ;;  %875 = vmatmul.f32.gmra.mxu3 %v751_v58  ;;  %933 = vmatmul.f32.gmra.mxu1 %v751_v58  ;;  %v735_v62 = vpop.f32.mrf.mxu1  ;;  %v970_v8 = vld [vmem:[#allocation11 + $0xb0] sm:$0xff] }
 0x180   : > { %1022 = vmatpush.msra.mxu3 %v970_v8 }
 0x181   : > { %v742_v63 = vmax.f32 %v675_v60, 0.0  ;;  %v736_v0 = vadd.f32 %v735_v62, %v707_v61 }
 0x182   : > { %1023 = vmatpush.msra.mxu3 %v969_v12 }
 0x183   : > { %v745_v1 = vmax.f32 %v736_v0, 0.0  ;;  %v750_v2 = vmin.f32 %v742_v63, 6.0 }
 0x184   : > { %v648_v3 = vpop.f32.mrf.mxu2  ;;  %1024 = vmatpush.msra.mxu3 %v968_v15 }
 0x185   : > { %v649_v4 = vadd.f32 %v648_v3, %v1802_v13  ;;  %846 = vmatmul.f32.gmra.mxu2 %v750_v2  ;;  %904 = vmatmul.f32.gmra.mxu0 %v750_v2  ;;  %v677_v5 = vpop.f32.mrf.mxu3  ;;  %v753_v6 = vmin.f32 %v745_v1, 6.0  ;;  %v954_v13 = vld [vmem:[#allocation11 + $0x30] sm:$0xff] }
 0x186   : > { %993 = vmatpush.msra.mxu2 %v954_v13  ;;  %1025 = vmatpush.msra.mxu3 %v967_v16 }
 0x187   : > { %v678_v7 = vadd.f32 %v677_v5, %v649_v4  ;;  %878 = vmatmul.f32.gmra.mxu3 %v753_v6  ;;  %936 = vmatmul.f32.gmra.mxu1 %v753_v6  ;;  %v1312_v6 = vld [vmem:[%s1859_s8] ss:$0 sm:$0xff] }
 0x188   : > { %994 = vmatpush.msra.mxu2 %v953_v17  ;;  %1026 = vmatpush.msra.mxu3 %v966_v18 }
 0x189   : > { %v744_v9 = vmax.f32 %v678_v7, 0.0 }
 0x18a   : > { %995 = vmatpush.msra.mxu2 %v952_v19  ;;  %1027 = vmatpush.msra.mxu3 %v965_v20 }
 0x18b   : > { %v752_v10 = vmin.f32 %v744_v9, 6.0 }
 0x18c   : > { %996 = vmatpush.msra.mxu2 %v951_v21  ;;  %1028 = vmatpush.msra.mxu3 %v964_v22 }
 0x18d   : > { %849 = vmatmul.f32.gmra.mxu2 %v752_v10  ;;  %907 = vmatmul.f32.gmra.mxu0 %v752_v10 }
 0x18e   : > { %997 = vmatpush.msra.mxu2 %v950_v23 }
 0x190   : > { %998 = vmatpush.msra.mxu2 %v949_v24 }
 0x192   : > { %999 = vmatpush.msra.mxu2 %v948_v25 }
 0x1ec   : > { %v928_v27 = vpop.f32.mrf.mxu1 }
 0x1f2   : > { %v899_v29 = vpop.f32.mrf.mxu0  ;;  %v870_v31 = vpop.f32.mrf.mxu3 }
 0x1f3   : > { %v900_v30 = vadd.f32 %v899_v29, %v821_v28 }
 0x1f4   : > { %v931_v35 = vpop.f32.mrf.mxu1 }
 0x1f5   : > { %v929_v32 = vadd.f32 %v928_v27, %v900_v30 }
 0x1f7   : > { %v941_v34 = vmax.f32 %v929_v32, 0.0 }
 0x1f8   : > { %v841_v36 = vpop.f32.mrf.mxu2 }
 0x1f9   : > { %v842_v39 = vadd.f32 %v841_v36, %v820_v33  ;;  %1029 = vmatmul.f32.vlgmr.msra.gmra.mxu3 %v941_v34 }
 0x1fa   : > { %v902_v40 = vpop.f32.mrf.mxu0  ;;  %v873_v45 = vpop.f32.mrf.mxu3 }
 0x1fb   : > { %v871_v41 = vadd.f32 %v870_v31, %v842_v39  ;;  %v903_v42 = vadd.f32 %v902_v40, %v821_v28 }
 0x1fc   : > { %v934_v49 = vpop.f32.mrf.mxu1 }
 0x1fd   : > { %v940_v43 = vmax.f32 %v871_v41, 0.0  ;;  %v932_v44 = vadd.f32 %v931_v35, %v903_v42 }
 0x1ff   : > { %1000 = vmatmul.f32.vlgmr.msra.gmra.mxu2 %v940_v43  ;;  %v943_v46 = vmax.f32 %v932_v44, 0.0 }
 0x200   : > { %v844_v47 = vpop.f32.mrf.mxu2 }
 0x201   : > { %v845_v48 = vadd.f32 %v844_v47, %v820_v33  ;;  %1032 = vmatmul.f32.gmra.mxu3 %v943_v46 }
 0x202   : > { %v905_v50 = vpop.f32.mrf.mxu0  ;;  %v876_v54 = vpop.f32.mrf.mxu3 }
 0x203   : > { %v906_v37 = vadd.f32 %v905_v50, %v821_v28  ;;  %v874_v38 = vadd.f32 %v873_v45, %v845_v48 }
 0x204   : > { %v937_v60 = vpop.f32.mrf.mxu1 }
 0x205   : > { %v942_v51 = vmax.f32 %v874_v38, 0.0  ;;  %v935_v52 = vadd.f32 %v934_v49, %v906_v37 }
 0x207   : > { %1003 = vmatmul.f32.gmra.mxu2 %v942_v51  ;;  %v945_v53 = vmax.f32 %v935_v52, 0.0 }
 0x208   : > { %v847_v55 = vpop.f32.mrf.mxu2 }
 0x209   : > { %v848_v56 = vadd.f32 %v847_v55, %v820_v33  ;;  %1035 = vmatmul.f32.gmra.mxu3 %v945_v53 }
 0x20a   : > { %v908_v57 = vpop.f32.mrf.mxu0  ;;  %v879_v2 = vpop.f32.mrf.mxu3 }
 0x20b   : > { %v909_v58 = vadd.f32 %v908_v57, %v821_v28  ;;  %v877_v59 = vadd.f32 %v876_v54, %v848_v56 }
 0x20d   : > { %v944_v61 = vmax.f32 %v877_v59, 0.0  ;;  %v938_v62 = vadd.f32 %v937_v60, %v909_v58 }
 0x20f   : > { %1006 = vmatmul.f32.gmra.mxu2 %v944_v61  ;;  %v947_v63 = vmax.f32 %v938_v62, 0.0 }
 0x210   : > { %v850_v0 = vpop.f32.mrf.mxu2 }
 0x211   : > { %v851_v1 = vadd.f32 %v850_v0, %v820_v33  ;;  %1038 = vmatmul.f32.gmra.mxu3 %v947_v63 }
 0x213   : > { %v880_v3 = vadd.f32 %v879_v2, %v851_v1 }
 0x215   : > { %v946_v4 = vmax.f32 %v880_v3, 0.0 }
 0x217   : > { %1009 = vmatmul.f32.gmra.mxu2 %v946_v4 }
 0x27c   : > { %v1030_v5 = vpop.f32.mrf.mxu3 }
 0x282   : > { %v1001_v7 = vpop.f32.mrf.mxu2 }
 0x283   : > { %v1002_v9 = vadd.f32 %v1312_v6, %v1001_v7 }
 0x284   : > { %v1033_v8 = vpop.f32.mrf.mxu3 }
 0x285   : > { %v1031_v10 = vadd.f32 %v1030_v5, %v1002_v9 }
 0x287   : > { %1042 = vst [vmem:[%s433_s22] sm:$0xff] %v1031_v10 }
 0x28a   : > { %v1004_v11 = vpop.f32.mrf.mxu2 }
 0x28b   : > { %v1005_v12 = vadd.f32 %v1312_v6, %v1004_v11 }
 0x28c   : > { %v1036_v15 = vpop.f32.mrf.mxu3 }
 0x28d   : > { %v1034_v14 = vadd.f32 %v1033_v8, %v1005_v12 }
 0x28f   : > { %1043 = vst [vmem:[%s433_s22 + $0x8] sm:$0xff] %v1034_v14 }
 0x292   : > { %v1007_v13 = vpop.f32.mrf.mxu2 }
 0x293   : > { %v1008_v16 = vadd.f32 %v1312_v6, %v1007_v13 }
 0x294   : > { %v1039_v20 = vpop.f32.mrf.mxu3 }
 0x295   : > { %v1037_v17 = vadd.f32 %v1036_v15, %v1008_v16 }
 0x297   : > { %1044 = vst [vmem:[%s433_s22 + $0x10] sm:$0xff] %v1037_v17 }
 0x29a   : > { %v1010_v18 = vpop.f32.mrf.mxu2 }
 0x29b   : > { %v1011_v19 = vadd.f32 %v1312_v6, %v1010_v18 }
 0x29d   : > { %v1040_v21 = vadd.f32 %v1039_v20, %v1011_v19 }
 0x29f   : > { %1045 = vst [vmem:[%s433_s22 + $0x18] sm:$0xff] %v1040_v21 }
 0x2a0   : > { %1520 = shalt.err (!%p1517_p8)
}
 0x2a1   : > { %s1582_s24 = smov 128   ;;  %s1583_s22 = smov 8  }
 0x2a2   : > { %1231 = dma.vmem_to_hbm [thread:$0]  (%p1722_p12), %s1060_s3, 512, %s1062_s2, %s1047_s25, %s1582_s24, %s1582_s24, %s1583_s22  }
 0x2a3 PF: > { %p1268_p9 = scmp.ge.s32.totalorder %s1571_s12, 2  ;;  %s1076_s27 = sand.u32 1, %s1559_s30  }
 0x2a4   : > { %s1077_s1 = scalar_lea.sflag [#allocation4], %s1076_s27 }
 0x2a5   : > { %p1254_p10 = pnand %p1268_p9, %p1727_p2 }
 0x2a7   : > { %p1255_p13 = pneg %p1254_p10 }
 0x2a9   : > { %1554 = dma.done.wait (%p1255_p13), %s1077_s1, 512  }
 0x2aa   : > { %1556 = vsyncadd (%p1255_p13), %s1077_s1, 4294966784  ;;  %p25_p0 = scmp.ge.s32.totalorder %s1702_s18, 6   ;;  %s1877_s30 = smov %s1563_s10 }
 0x2ab   : > { %s1878_s10 = smov %s1567_s11  ;;  %s1879_s11 = smov %s1714_s13 }
 0x2ac   : > { %s1880_s12 = smov %s1702_s18  ;;  %27 = sbr.rel (!%p25_p0) target bundleno = 12 (0xc), region = 121 }
 0x2b1   :  { %1083 = vsyncpa [#allocation3], 1 }
 0x2b2   :  { %1085 = vsyncpa [#allocation3 + $0x1], 1 }
 0x2b3   :  { %1086 = vsyncpa [#allocation6], 1 }
 0x2b4   :  { %1087 = vsyncpa [#allocation9], 1 }
 0x2b5   :  { %1088 = vsyncpa [#allocation12], 1 }
 0x2b6   :  { %1089 = vsyncpa [#allocation4], 1 }
 0x2b7   :  { %1091 = vsyncpa [#allocation4 + $0x1], 1 }

</bundles_post_ra>
